<compile_context>
chip_gen: v7x
topology: tpu7x:2x2x1
jax: 0.10.0
libtpu: 0.0.40
codegen_flags: <defaults>
</compile_context>

<pallas_src>
import functools

import jax
import jax.numpy as jnp
from jax.experimental import pallas as pl
from jax.experimental.pallas import tpu as pltpu


def _group_norm_kernel(x_ref, *refs, eps, affine, subtractive, divisive, inv_n):
    # x_ref block: (rows, Lp) — each row is one (batch, group) instance,
    # lanes are the flattened (Cg, H, W) values (zero-padded to Lp).
    if affine:
        w_ref, b_ref, o_ref = refs
    else:
        (o_ref,) = refs

    x = x_ref[...].astype(jnp.float32)                      # (rows, Lp)

    # Single-pass statistics: zero pads contribute 0 to both sums, and inv_n
    # uses the true (unpadded) element count, so the stats are exact.
    s = jnp.sum(x, axis=1, keepdims=True)                   # (rows, 1)
    mean = s * inv_n

    if subtractive and not divisive:
        y = x - mean
    else:
        ss = jnp.sum(x * x, axis=1, keepdims=True)          # (rows, 1)
        var = jnp.maximum(ss * inv_n - mean * mean, 0.0)    # biased var (ddof=0)
        inv_std = jax.lax.rsqrt(var + eps)
        if divisive and not subtractive:
            y = x * inv_std
        else:
            y = (x - mean) * inv_std

    if affine:
        # Per-channel weight/bias, pre-broadcast along the lane axis by the
        # wrapper so this is a plain elementwise multiply-add.
        y = y * w_ref[...].astype(jnp.float32) + b_ref[...].astype(jnp.float32)

    o_ref[...] = y.astype(o_ref.dtype)


def _round_up(x, m):
    return (x + m - 1) // m * m


def _vmem_capacity_bytes():
    try:
        return int(pltpu.get_tpu_info().vmem_capacity_bytes)
    except Exception:
        return 64 << 20  # conservative (v7x-sized) fallback


def _block_bytes(rows, lanes, itemsize):
    sub_pack = 8 * max(1, 4 // itemsize)                    # f32: 8, bf16: 16
    return _round_up(rows, sub_pack) * _round_up(lanes, 128) * itemsize


def _estimate_vmem(rows, lanes, itemsize, affine):
    blk_io = _block_bytes(rows, lanes, itemsize)
    blk_f32 = _block_bytes(rows, lanes, 4)
    n_io_bufs = 4 + (4 if affine else 0)                    # double-buffered x/out (+ w/b)
    return n_io_bufs * blk_io + 3 * blk_f32 + (1 << 20)


def _choose_rows_per_block(R, G, lanes, itemsize, affine, budget):
    """Largest divisor of R (= B*G rows) whose full VMEM footprint fits budget.

    Candidates must be a multiple of 8 (sublane alignment) unless they cover
    the whole array, and must either divide G or be a multiple of G so the
    affine rows can be mapped by the BlockSpec index_map.
    """
    cands = []
    for d in range(1, R + 1):
        if R % d:
            continue
        if d != R and d % 8 != 0:
            continue
        if d % G != 0 and G % d != 0:
            continue
        cands.append(d)
    # d == R always qualifies, so cands is never empty.
    fitting = [d for d in cands if _estimate_vmem(d, lanes, itemsize, affine) <= budget]
    if not fitting:
        # TODO(synk): add a lane-tiled two-sweep path (sum/sumsq sweep then
        # normalize sweep) for huge Cg*H*W rows that do not fit VMEM at all.
        return min(cands)
    best = max(fitting)
    # v7x megacore: mildly prefer an even number of grid steps so the two
    # TensorCores sharing the "parallel" axis stay balanced.
    even = [d for d in fitting if (R // d) % 2 == 0]
    if even:
        best_even = max(even)
        if 2 * best_even >= best:
            best = best_even
    return best


def custom_group_norm(x, weight=None, bias=None, *, num_groups, eps=1e-5,
                      affine=True, subtractive=False, divisive=False):
    """Pallas implementation of CustomGroupNorm.forward.

    x:      (B, C, H, W)
    weight: (1, C, 1, 1)   (required iff affine=True)
    bias:   (1, C, 1, 1)   (required iff affine=True)
    """
    B, C, H, W = x.shape
    G = num_groups
    assert C % G == 0, "num_channels must be divisible by num_groups"
    if affine:
        assert weight is not None and bias is not None, "affine=True requires weight and bias"
    Cg = C // G
    HW = H * W
    L = Cg * HW                     # true per-group element count
    R = B * G                       # one row per (batch, group) instance
    itemsize = jnp.dtype(x.dtype).itemsize

    # Lane-dense layout: pad the flattened per-group row to a multiple of 128
    # so stores are unmasked.  Pads are zeros, so the single-pass sum/sumsq
    # statistics (divided by the true count L) remain exact.
    Lp = _round_up(L, 128)
    x_r = x.reshape(R, L)           # contiguous reshape: free
    if Lp != L:
        x_r = jnp.pad(x_r, ((0, 0), (0, Lp - L)))

    vmem_cap = _vmem_capacity_bytes()
    budget = int(vmem_cap * 0.6)    # leave headroom for compiler scratch
    rows_per_block = _choose_rows_per_block(R, G, Lp, itemsize, affine, budget)
    n_blocks = R // rows_per_block

    kernel = functools.partial(
        _group_norm_kernel,
        eps=float(eps), affine=affine, subtractive=subtractive,
        divisive=divisive, inv_n=1.0 / L,
    )

    x_spec = pl.BlockSpec((rows_per_block, Lp), lambda i: (i, 0))
    in_specs = [x_spec]
    args = [x_r]

    if affine:
        # Pre-broadcast per-channel affine to per-group rows: row g is
        # [w[g,0]]*HW ++ [w[g,1]]*HW ++ ...  (matches the data row layout).
        w_gc = weight.reshape(G, Cg)
        b_gc = bias.reshape(G, Cg)
        w_full = jnp.broadcast_to(w_gc[:, :, None], (G, Cg, HW)).reshape(G, L)
        b_full = jnp.broadcast_to(b_gc[:, :, None], (G, Cg, HW)).reshape(G, L)
        if Lp != L:
            w_full = jnp.pad(w_full, ((0, 0), (0, Lp - L)))
            b_full = jnp.pad(b_full, ((0, 0), (0, Lp - L)))
        if rows_per_block >= G:
            # Common case: tile to one block and use a constant index_map so
            # weight/bias are DMA'd once and stay VMEM-resident.
            reps = rows_per_block // G
            w_full = jnp.tile(w_full, (reps, 1))
            b_full = jnp.tile(b_full, (reps, 1))
            n_wblocks = 1
        else:
            # TODO(synk): when rows_per_block < G (huge groups) the affine
            # tiles are re-fetched every step; keep per-channel scale/shift in
            # SMEM and broadcast in-kernel to avoid the extra traffic.
            n_wblocks = G // rows_per_block
        wb_spec = pl.BlockSpec((rows_per_block, Lp), lambda i: (i % n_wblocks, 0))
        in_specs += [wb_spec, wb_spec]
        args += [w_full, b_full]

    # Generation-aware VMEM limit: sized from the actual padded footprint,
    # capped at ~3/4 of physical VMEM (≈96 MiB on v5e/v6e, ≈48 MiB on v7x).
    vmem_est = _estimate_vmem(rows_per_block, Lp, itemsize, affine)
    vmem_limit = int(min(max(vmem_est, 16 << 20), int(vmem_cap * 0.75)))
    if vmem_est > vmem_limit:
        vmem_limit = int(min(vmem_est, int(vmem_cap * 0.95)))

    out = pl.pallas_call(
        kernel,
        grid=(n_blocks,),
        in_specs=in_specs,
        out_specs=x_spec,
        out_shape=jax.ShapeDtypeStruct((R, Lp), x.dtype),
        compiler_params=pltpu.CompilerParams(
            dimension_semantics=("parallel",),
            vmem_limit_bytes=vmem_limit,
        ),
    )(*args)

    if Lp != L:
        out = out[:, :L]
    return out.reshape(B, C, H, W)


def _reference_group_norm(x, weight, bias, *, num_groups, eps=1e-5, affine=True,
                          subtractive=False, divisive=False):
    """Pure-JAX reference matching the PyTorch module semantics."""
    B, C, H, W = x.shape
    G = num_groups
    xr = x.reshape(B, G, C // G, H, W)
    mean = jnp.mean(xr, axis=(2, 3, 4), keepdims=True)
    var = jnp.var(xr, axis=(2, 3, 4), keepdims=True)  # unbiased=False
    if subtractive and not divisive:
        xr = xr - mean
    elif divisive and not subtractive:
        xr = xr / jnp.sqrt(var + eps)
    else:
        xr = (xr - mean) / jnp.sqrt(var + eps)
    y = xr.reshape(B, C, H, W)
    if affine:
        y = y * weight + bias
    return y


if __name__ == "__main__":
    # Deterministic small example consistent with the module's forward (NCHW).
    B, C, H, W = 2, 4, 16, 16
    num_groups = 2
    eps = 1e-5

    kx, kw, kb = jax.random.split(jax.random.PRNGKey(0), 3)
    x = jax.random.normal(kx, (B, C, H, W), dtype=jnp.float32)

    # Parameters as in __init__ (ones / zeros), perturbed so affine is non-trivial.
    weight = jnp.ones((1, C, 1, 1), jnp.float32) + 0.1 * jax.random.normal(kw, (1, C, 1, 1))
    bias = jnp.zeros((1, C, 1, 1), jnp.float32) + 0.1 * jax.random.normal(kb, (1, C, 1, 1))

    # 1) Standard path with affine.
    out = custom_group_norm(x, weight, bias, num_groups=num_groups, eps=eps,
                            affine=True, subtractive=False, divisive=False)
    out = jax.block_until_ready(out)
    ref = _reference_group_norm(x, weight, bias, num_groups=num_groups, eps=eps,
                                affine=True, subtractive=False, divisive=False)
    assert out.shape == (B, C, H, W)
    assert jnp.allclose(out, ref, atol=1e-4, rtol=1e-4), "affine mismatch vs reference"

    # 2) affine=False path (no weight/bias passed to pallas_call at all).
    out2 = jax.block_until_ready(
        custom_group_norm(x, num_groups=num_groups, eps=eps, affine=False))
    ref2 = _reference_group_norm(x, None, None, num_groups=num_groups, eps=eps, affine=False)
    assert jnp.allclose(out2, ref2, atol=1e-4, rtol=1e-4), "no-affine mismatch vs reference"

    # 3) subtractive-only and divisive-only variants.
    out3 = jax.block_until_ready(
        custom_group_norm(x, weight, bias, num_groups=num_groups, eps=eps,
                          affine=True, subtractive=True, divisive=False))
    ref3 = _reference_group_norm(x, weight, bias, num_groups=num_groups, eps=eps,
                                 affine=True, subtractive=True, divisive=False)
    assert jnp.allclose(out3, ref3, atol=1e-4, rtol=1e-4), "subtractive mismatch"

    out4 = jax.block_until_ready(
        custom_group_norm(x, weight, bias, num_groups=num_groups, eps=eps,
                          affine=True, subtractive=False, divisive=True))
    ref4 = _reference_group_norm(x, weight, bias, num_groups=num_groups, eps=eps,
                                 affine=True, subtractive=False, divisive=True)
    assert jnp.allclose(out4, ref4, atol=1e-4, rtol=1e-4), "divisive mismatch"

    # 4) Non-128-multiple spatial size exercises the zero-pad / slice path.
    B2, C2, H2, W2, G2 = 2, 6, 5, 5, 3
    kx2, kw2, kb2 = jax.random.split(jax.random.PRNGKey(1), 3)
    x2 = jax.random.normal(kx2, (B2, C2, H2, W2), dtype=jnp.float32)
    w2 = jnp.ones((1, C2, 1, 1), jnp.float32) + 0.1 * jax.random.normal(kw2, (1, C2, 1, 1))
    b2 = jnp.zeros((1, C2, 1, 1), jnp.float32) + 0.1 * jax.random.normal(kb2, (1, C2, 1, 1))
    out5 = jax.block_until_ready(
        custom_group_norm(x2, w2, b2, num_groups=G2, eps=eps, affine=True))
    ref5 = _reference_group_norm(x2, w2, b2, num_groups=G2, eps=eps, affine=True)
    assert jnp.allclose(out5, ref5, atol=1e-4, rtol=1e-4), "padded-spatial mismatch"

    print("KERNEL_OK")
</pallas_src>

<mosaic_0001>
module attributes {stable_mosaic.version = 11 : i64} {
  func.func @_group_norm_kernel(%arg0: i32, %arg1: memref<4x512xf32, #tpu.memory_space<vmem>>, %arg2: memref<4x512xf32, #tpu.memory_space<vmem>>, %arg3: memref<4x512xf32, #tpu.memory_space<vmem>>, %arg4: memref<4x512xf32, #tpu.memory_space<vmem>>) attributes {dimension_semantics = [#tpu.dimension_semantics<parallel>], iteration_bounds = array<i64: 1>, scalar_prefetch = 0 : i64, scratch_operands = 0 : i64, tpu.core_type = #tpu.core_type<tc>, window_params = [{transform_indices = @transform_0, window_bounds = array<i64: 4, 512>}, {transform_indices = @transform_1, window_bounds = array<i64: 4, 512>}, {transform_indices = @transform_2, window_bounds = array<i64: 4, 512>}, {transform_indices = @transform_3, window_bounds = array<i64: 4, 512>}]} {
    %c0 = arith.constant 0 : index
    %c0_0 = arith.constant 0 : index
    %0 = vector.load %arg1[%c0, %c0_0] : memref<4x512xf32, #tpu.memory_space<vmem>>, vector<4x512xf32>
    %cst = arith.constant dense<0.000000e+00> : vector<4xf32>
    %1 = vector.multi_reduction <add>, %0, %cst [1] : vector<4x512xf32> to vector<4xf32>
    %2 = vector.shape_cast %1 : vector<4xf32> to vector<4x1xf32>
    %cst_1 = arith.constant 0.001953125 : f32
    %3 = vector.broadcast %cst_1 : f32 to vector<4x1xf32>
    %4 = arith.mulf %2, %3 : vector<4x1xf32>
    %5 = arith.mulf %0, %0 : vector<4x512xf32>
    %cst_2 = arith.constant dense<0.000000e+00> : vector<4xf32>
    %6 = vector.multi_reduction <add>, %5, %cst_2 [1] : vector<4x512xf32> to vector<4xf32>
    %7 = vector.shape_cast %6 : vector<4xf32> to vector<4x1xf32>
    %cst_3 = arith.constant 0.001953125 : f32
    %8 = vector.broadcast %cst_3 : f32 to vector<4x1xf32>
    %9 = arith.mulf %7, %8 : vector<4x1xf32>
    %10 = arith.mulf %4, %4 : vector<4x1xf32>
    %11 = arith.subf %9, %10 : vector<4x1xf32>
    %cst_4 = arith.constant 0.000000e+00 : f32
    %12 = vector.broadcast %cst_4 : f32 to vector<4x1xf32>
    %13 = arith.maximumf %11, %12 : vector<4x1xf32>
    %cst_5 = arith.constant 9.99999974E-6 : f32
    %14 = vector.broadcast %cst_5 : f32 to vector<4x1xf32>
    %15 = arith.addf %13, %14 : vector<4x1xf32>
    %16 = math.rsqrt %15 : vector<4x1xf32>
    %17 = vector.broadcast %4 : vector<4x1xf32> to vector<4x512xf32>
    %18 = arith.subf %0, %17 : vector<4x512xf32>
    %19 = vector.broadcast %16 : vector<4x1xf32> to vector<4x512xf32>
    %20 = arith.mulf %18, %19 : vector<4x512xf32>
    %c0_6 = arith.constant 0 : index
    %c0_7 = arith.constant 0 : index
    %21 = vector.load %arg2[%c0_6, %c0_7] : memref<4x512xf32, #tpu.memory_space<vmem>>, vector<4x512xf32>
    %22 = arith.mulf %20, %21 : vector<4x512xf32>
    %c0_8 = arith.constant 0 : index
    %c0_9 = arith.constant 0 : index
    %23 = vector.load %arg3[%c0_8, %c0_9] : memref<4x512xf32, #tpu.memory_space<vmem>>, vector<4x512xf32>
    %24 = arith.addf %22, %23 : vector<4x512xf32>
    %c0_10 = arith.constant 0 : index
    %c0_11 = arith.constant 0 : index
    %25 = vector.load %arg4[%c0_10, %c0_11] : memref<4x512xf32, #tpu.memory_space<vmem>>, vector<4x512xf32>
    tpu.vector_store %arg4[%c0_10, %c0_11], %24 {strides = array<i32>} : memref<4x512xf32, #tpu.memory_space<vmem>>, vector<4x512xf32>,
    return
  }
  func.func @transform_0(%arg0: i32) -> (i32, i32) {
    %c0_i32 = arith.constant 0 : i32
    %c0_i32_0 = arith.constant 0 : i32
    return %arg0, %c0_i32 : i32, i32
  }
  func.func @transform_1(%arg0: i32) -> (i32, i32) {
    %c1_i32 = arith.constant 1 : i32
    %c0_i32 = arith.constant 0 : i32
    %0 = arith.cmpi eq, %c1_i32, %c0_i32 : i32
    %c1_i32_0 = arith.constant 1 : i32
    %1 = arith.select %0, %c1_i32_0, %c1_i32 : i32
    %2 = arith.remsi %arg0, %1 : i32
    %c0_i32_1 = arith.constant 0 : i32
    %3 = arith.cmpi ne, %2, %c0_i32_1 : i32
    %c0_i32_2 = arith.constant 0 : i32
    %4 = arith.cmpi slt, %2, %c0_i32_2 : i32
    %c0_i32_3 = arith.constant 0 : i32
    %5 = arith.cmpi slt, %1, %c0_i32_3 : i32
    %6 = arith.xori %4, %5 : i1
    %7 = arith.andi %6, %3 : i1
    %8 = arith.addi %2, %1 : i32
    %9 = arith.select %7, %8, %2 : i32
    %c0_i32_4 = arith.constant 0 : i32
    %c0_i32_5 = arith.constant 0 : i32
    return %9, %c0_i32_4 : i32, i32
  }
  func.func @transform_2(%arg0: i32) -> (i32, i32) {
    %c1_i32 = arith.constant 1 : i32
    %c0_i32 = arith.constant 0 : i32
    %0 = arith.cmpi eq, %c1_i32, %c0_i32 : i32
    %c1_i32_0 = arith.constant 1 : i32
    %1 = arith.select %0, %c1_i32_0, %c1_i32 : i32
    %2 = arith.remsi %arg0, %1 : i32
    %c0_i32_1 = arith.constant 0 : i32
    %3 = arith.cmpi ne, %2, %c0_i32_1 : i32
    %c0_i32_2 = arith.constant 0 : i32
    %4 = arith.cmpi slt, %2, %c0_i32_2 : i32
    %c0_i32_3 = arith.constant 0 : i32
    %5 = arith.cmpi slt, %1, %c0_i32_3 : i32
    %6 = arith.xori %4, %5 : i1
    %7 = arith.andi %6, %3 : i1
    %8 = arith.addi %2, %1 : i32
    %9 = arith.select %7, %8, %2 : i32
    %c0_i32_4 = arith.constant 0 : i32
    %c0_i32_5 = arith.constant 0 : i32
    return %9, %c0_i32_4 : i32, i32
  }
  func.func @transform_3(%arg0: i32) -> (i32, i32) {
    %c0_i32 = arith.constant 0 : i32
    %c0_i32_0 = arith.constant 0 : i32
    return %arg0, %c0_i32 : i32, i32
  }
}

</mosaic_0001>

<bundles_post_ra>
// kernel: tpu_custom_call.1
= control target key start
LH: loop header
LB: loop body
LE: loop exit
PB: predicated region body
PF: predicated region fallthrough
CT: control target
= control target key end

     0   :  { %8 = vsyncpa [#allocation3], 0  ;;  %s324_s0 = inlined_call_operand.hbm [shape: f32[4,512], index: 0, kind: input, shape index: {}]   ;;  %s325_s1 = inlined_call_operand.hbm [shape: f32[4,512], index: 1, kind: input, shape index: {}]   ;;  %s326_s2 = inlined_call_operand.hbm [shape: f32[4,512], index: 2, kind: input, shape index: {}]   ;;  %s327_s3 = inlined_call_operand.hbm [shape: f32[4,512], index: 3, kind: output, shape index: {}]  }
   0x1   :  { %9 = vsyncpa [#allocation6], 0 }
   0x2   :  { %10 = vsyncpa [#allocation4], 0  ;;  %s243_s12 = smov [#allocation5]   ;;  %s244_s14 = smov [#allocation2]  }
   0x3   :  { %s27_s13 = sshll.u32 %s243_s12, 4  ;;  %s17_s15 = sshll.u32 %s244_s14, 4  ;;  %s28_s13 = int_to_ptr.vmem [resolvable:$true] %s27_s13  ;;  %s18_s15 = int_to_ptr.vmem [resolvable:$true] %s17_s15 }
   0x4   :  { %s149_s18 = scalar_lea.hbm %s325_s1, 256 }
   0x5   :  { %p150_p0 = scmp.ne.s32.totalorder %s325_s1, %s149_s18  ;;  %p153_p1 = scmp.lt.u32.totalorder %s149_s18, %s325_s1 }
   0x7   :  { %p155_p2 = pnand %p153_p1, %p150_p0 }
   0x9   :  { %158 = shalt.err (!%p155_p2)
}
   0xa   :  { %s159_s23 = scalar_lea.vmem %s28_s13, 256  ;;  %p164_p4 = scmp.lt.s32.totalorder %s28_s13, %s28_s13 }
   0xb   :  { %p160_p3 = scmp.ne.s32.totalorder %s28_s13, %s159_s23  ;;  %p165_p5 = scmp.lt.s32.totalorder %s159_s23, %s159_s23 }
   0xd   :  { %p166_p6 = por %p165_p5, %p164_p4 }
   0xf   :  { %p167_p7 = pnand %p166_p6, %p160_p3 }
  0x11   :  { %170 = shalt.err (!%p167_p7)
}
  0x12   :  { %30 = dma.hbm_to_vmem [thread:$0]  %s325_s1, 256, %s28_s13, [#allocation6]  }
  0x13   :  { %s171_s28 = scalar_lea.hbm %s324_s0, 256 }
  0x14   :  { %p172_p8 = scmp.ne.s32.totalorder %s324_s0, %s171_s28  ;;  %p175_p9 = scmp.lt.u32.totalorder %s171_s28, %s324_s0 }
  0x16   :  { %p177_p10 = pnand %p175_p9, %p172_p8 }
  0x18   :  { %180 = shalt.err (!%p177_p10)
}
  0x19   :  { %s181_s6 = scalar_lea.vmem %s18_s15, 256  ;;  %p186_p12 = scmp.lt.s32.totalorder %s18_s15, %s18_s15 }
  0x1a   :  { %p182_p11 = scmp.ne.s32.totalorder %s18_s15, %s181_s6  ;;  %p187_p13 = scmp.lt.s32.totalorder %s181_s6, %s181_s6 }
  0x1c   :  { %p188_p0 = por %p187_p13, %p186_p12 }
  0x1e   :  { %p189_p1 = pnand %p188_p0, %p182_p11 }
  0x20   :  { %192 = shalt.err (!%p189_p1)
}
  0x21   :  { %20 = dma.hbm_to_vmem [thread:$0]  %s324_s0, 256, %s18_s15, [#allocation3]  }
  0x22   :  { %s245_s8 = smov [#allocation7]   ;;  %s193_s12 = scalar_lea.hbm %s326_s2, 256 }
  0x23   :  { %s37_s9 = sshll.u32 %s245_s8, 4  ;;  %p194_p2 = scmp.ne.s32.totalorder %s326_s2, %s193_s12  ;;  %s38_s9 = int_to_ptr.vmem [resolvable:$true] %s37_s9 }
  0x24   :  { %p197_p3 = scmp.lt.u32.totalorder %s193_s12, %s326_s2 }
  0x26   :  { %p199_p4 = pnand %p197_p3, %p194_p2 }
  0x28   :  { %202 = shalt.err (!%p199_p4)
}
  0x29   :  { %s203_s18 = scalar_lea.vmem %s38_s9, 256  ;;  %p208_p6 = scmp.lt.s32.totalorder %s38_s9, %s38_s9 }
  0x2a   :  { %p204_p5 = scmp.ne.s32.totalorder %s38_s9, %s203_s18  ;;  %p209_p7 = scmp.lt.s32.totalorder %s203_s18, %s203_s18 }
  0x2c   :  { %p210_p8 = por %p209_p7, %p208_p6 }
  0x2e   :  { %p211_p9 = pnand %p210_p8, %p204_p5 }
  0x30   :  { %214 = shalt.err (!%p211_p9)
}
  0x31   :  { %40 = dma.hbm_to_vmem [thread:$0]  %s326_s2, 256, %s38_s9, [#allocation6]  }
  0x32   :  { %237 = dma.done.wait [#allocation3], 256  }
  0x33   :  { %238 = vsyncadd [#allocation3], 4294967040 }
  0x34   :  { %239 = dma.done.wait [#allocation6], 512  }
  0x35   :  { %240 = vsyncadd [#allocation6], 4294966784  ;;  %vm58_vm0 = vcmask 1043456   ;;  %v50_v0 = vld [vmem:[#allocation2] sm:$0xff]  ;;  %v51_v1 = vld [vmem:[#allocation2 + $0x8] sm:$0xff]  ;;  %v96_v30 = vlaneseq  ;;  %s247_s2 = smov [#allocation8]  }
  0x36   :  { %v54_v2 = vcombine.high %v50_v0, %v50_v0  ;;  %v55_v3 = vcombine.high %v51_v1, %v51_v1  ;;  %v59_v4 = vsel %vm58_vm0, %v50_v0, 0.0  ;;  %v69_v5 = vmul.f32 %v50_v0, %v50_v0  ;;  %v114_v41 = vld [vmem:[#allocation5] sm:$0xff]  ;;  %v115_v42 = vld [vmem:[#allocation5 + $0x8] sm:$0xff]  ;;  %v118_v45 = vld [vmem:[#allocation7] sm:$0xff]  ;;  %s130_s19 = sshll.u32 %s247_s2, 4  ;;  %s131_s19 = int_to_ptr.vmem [resolvable:$true] %s130_s19 }
  0x37   :  { %v70_v6 = vmul.f32 %v51_v1, %v51_v1  ;;  %v62_v8 = vsel %vm58_vm0, %v51_v1, 0.0  ;;  %v246_v28 = vmov 839922192   ;;  %v97_v34 = vshrl.u32 %v96_v30, 7  ;;  %v119_v46 = vld [vmem:[#allocation7 + $0x8] sm:$0xff]  ;;  %s215_s20 = scalar_lea.vmem %s131_s19, 256  ;;  %p220_p11 = scmp.lt.s32.totalorder %s131_s19, %s131_s19 }
  0x38   :  { %v60_v7 = vsel %vm58_vm0, %v54_v2, 0.0  ;;  %v73_v10 = vcombine.high %v69_v5, %v69_v5  ;;  %v77_v12 = vsel %vm58_vm0, %v69_v5, 0.0  ;;  %v64_v13 = vsel %vm58_vm0, %v55_v3, 0.0  ;;  %p216_p10 = scmp.ne.s32.totalorder %s131_s19, %s215_s20  ;;  %p221_p12 = scmp.lt.s32.totalorder %s215_s20, %s215_s20 }
  0x39   :  { %v61_v9 = vadd.f32 %v60_v7, %v59_v4  ;;  %v74_v11 = vcombine.high %v70_v6, %v70_v6  ;;  %v80_v16 = vsel %vm58_vm0, %v70_v6, 0.0  ;;  %v94_v29 = vunpack.c.l.s4 %v246_v28 }
  0x3a   :  { %v78_v15 = vsel %vm58_vm0, %v73_v10, 0.0  ;;  %p222_p13 = por %p221_p12, %p220_p11 }
  0x3b   :  { %v63_v14 = vadd.f32 %v62_v8, %v61_v9  ;;  %v79_v17 = vadd.f32 %v78_v15, %v77_v12  ;;  %v82_v19 = vsel %vm58_vm0, %v74_v11, 0.0  ;;  %v95_v33 = vunpack.c.0.s8 %v94_v29 }
  0x3c   :  { %p223_p0 = pnand %p222_p13, %p216_p10 }
  0x3d   :  { %v65_v18 = vadd.f32 %v64_v13, %v63_v14  ;;  %v81_v20 = vadd.f32 %v80_v16, %v79_v17  ;;  %v98_v35 = vsub.s32 %v95_v33, %v97_v34 }
  0x3f   :  { %66 = vadd.xlane.f32.xlu0 %v65_v18  ;;  %v83_v21 = vadd.f32 %v82_v19, %v81_v20 }
  0x43   :  { %84 = vadd.xlane.f32.xlu0 %v83_v21 }
  0xcc   :  { %v67_v22 = vpop.xlane.xlu0 %66 }
  0xcd   :  { %v68_v23 = vmul.f32 0.001953125, %v67_v22 }
  0xcf   :  { %v87_v25 = vmul.f32 %v68_v23, %v68_v23  ;;  %v99_v36 = vrot.slane %v68_v23, %v98_v35 }
  0xd0   :  { %v85_v24 = vpop.xlane.xlu0 %84 }
  0xd1   :  { %v86_v26 = vmul.f32 0.001953125, %v85_v24  ;;  %v101_v38 = vsub.f32 %v50_v0, %v99_v36  ;;  %v102_v39 = vsub.f32 %v51_v1, %v99_v36 }
  0xd3   :  { %v88_v27 = vsub.f32 %v86_v26, %v87_v25 }
  0xd5   :  { %v89_v31 = vmax.f32 %v88_v27, 0.0 }
  0xd7   :  { %v90_v32 = vadd.f32 1e-05, %v89_v31 }
  0xd9   :  { %147 = vrsqrt.f32 %v90_v32 }
  0xe3   :  { %v148_v37 = vpop.eup %147 }
  0xe4   :  { %v110_v40 = vrot.slane %v148_v37, %v98_v35 }
  0xe6   :  { %v112_v43 = vmul.f32 %v110_v40, %v101_v38  ;;  %v113_v44 = vmul.f32 %v110_v40, %v102_v39 }
  0xe8   :  { %v116_v47 = vmul.f32 %v114_v41, %v112_v43  ;;  %v117_v48 = vmul.f32 %v115_v42, %v113_v44 }
  0xea   :  { %v120_v49 = vadd.f32 %v118_v45, %v116_v47  ;;  %v121_v50 = vadd.f32 %v119_v46, %v117_v48 }
  0xec   :  { %122 = vst [vmem:[#allocation8] sm:$0xff] %v120_v49  ;;  %123 = vst [vmem:[#allocation8 + $0x8] sm:$0xff] %v121_v50 }
  0xed   :  { %226 = shalt.err (!%p223_p0)
}
  0xee   :  { %s227_s23 = scalar_lea.hbm %s327_s3, 256 }
  0xef   :  { %p228_p1 = scmp.ne.s32.totalorder %s327_s3, %s227_s23  ;;  %p231_p2 = scmp.lt.u32.totalorder %s227_s23, %s327_s3 }
  0xf1   :  { %p233_p3 = pnand %p231_p2, %p228_p1 }
  0xf3   :  { %236 = shalt.err (!%p233_p3)
}
  0xf4   :  { %133 = dma.vmem_to_hbm [thread:$0]  %s131_s19, 256, %s327_s3, [#allocation4]  }
  0xf5   :  { %241 = dma.done.wait [#allocation4], 256  }
  0xf6   :  { %242 = vsyncadd [#allocation4], 4294967040 }
  0xf7   :  { %137 = vsyncpa [#allocation3], 1 }
  0xf8   :  { %138 = vsyncpa [#allocation6], 1 }
  0xf9   :  { %139 = vsyncpa [#allocation4], 1 }

</bundles_post_ra>
